<compile_context>
chip_gen: v6e
topology: v6e:2x2x1
jax: 0.10.0
libtpu: 0.0.40
codegen_flags: <defaults>
</compile_context>

<pallas_src>
import functools
import numpy as np
import jax
import jax.numpy as jnp
from jax.experimental import pallas as pl
from jax.experimental.pallas import tpu as pltpu


# MXU operand dtype.  f32 keeps the tiny verification shapes bit-close to the
# f32 reference; set to jnp.bfloat16 for production on v6e/v7x (accumulation
# and all epilogue math stay f32 either way).
MXU_DTYPE = jnp.float32


def _ru(n, m):
    return (n + m - 1) // m * m


def _mx(v):
    return v.astype(MXU_DTYPE)


def _sigmoid(y):                      # exact: feeds the deform GEMM via the mask
    return 1.0 / (1.0 + jnp.exp(-y))


def _silu(y):
    return y * _sigmoid(y)


# --------------------- pltpu.roll direction probe ------------------------------
# The conv taps are built with static lane rotations; we rely on
# pltpu.roll(x, s, axis) == np.roll(x, s, axis).  Probe once (outside jit) so the
# static shifts are built with the right sign on any backend revision.
_ROLL_IS_NP = [True]


def _probe_roll_semantics():
    def k(x_ref, o_ref):
        o_ref[...] = pltpu.roll(x_ref[...], 1, axis=1)

    x = jnp.broadcast_to(jnp.arange(128, dtype=jnp.float32), (8, 128))
    out = pl.pallas_call(k, out_shape=jax.ShapeDtypeStruct((8, 128), jnp.float32))(x)
    _ROLL_IS_NP[0] = bool(np.asarray(out)[0, 0] == 127.0)


def _tap_shift(d, n):
    # shift s such that roll(x, s)[p] == x[(p + d) % n]
    return ((-d) % n) if _ROLL_IS_NP[0] else (d % n)


# ------------------------------ the fused kernel --------------------------------

def _amf_kernel(x1_ref, x2_ref, w1_ref, w_om_ref, b_om_ref, w_def_ref,
                w_1x1_ref, aff_ref, g_ref, o_ref, cols_ref, om_ref, *, H, W):
    HW = H * W
    C = x1_ref.shape[1]
    CP = _ru(C, 8)                     # channel count padded to a sublane multiple

    x1 = x1_ref[...][0]                # (C, HW) lane-dense
    x2 = x2_ref[...][0]

    # folded conv-bias + inference-BatchNorm affine constants (one packed table)
    s1 = aff_ref[:, 0:1]; b1 = aff_ref[:, 1:2]     # BN1 (after conv1)
    s2 = aff_ref[:, 2:3]; b2 = aff_ref[:, 3:4]     # BN2 (+ deform-conv bias)
    s3 = aff_ref[:, 4:5]; b3 = aff_ref[:, 5:6]     # BN3 (outer Sequential)
    s4 = aff_ref[:, 6:7]; b4 = aff_ref[:, 7:8]     # BN of the 1x1 branch (+ bias)

    cols_ref[...] = jnp.zeros_like(cols_ref)       # clear channel-pad rows once

    pos = jax.lax.broadcasted_iota(jnp.int32, (1, HW), 1)
    wcol = pos % W                                 # image column of each lane
    rw = pos - wcol                                # image row * W (no integer //)

    def im2col(x):
        # 3x3 / pad-1 im2col: 9 XLU lane rotations + border masks, written
        # tap-major into cols_ref rows [k*CP, k*CP + C) (tile-aligned stores).
        for ki in range(3):
            for kj in range(3):
                k = ki * 3 + kj
                d = (ki - 1) * W + (kj - 1)
                tap = pltpu.roll(x, _tap_shift(d, HW), axis=1) if d != 0 else x
                conds = []
                if ki == 0:
                    conds.append(rw >= W)
                elif ki == 2:
                    conds.append(rw <= (H - 2) * W)
                if kj == 0:
                    conds.append(wcol >= 1)
                elif kj == 2:
                    conds.append(wcol <= W - 2)
                if conds:
                    v = conds[0]
                    for c2 in conds[1:]:
                        v = jnp.logical_and(v, c2)
                    tap = jnp.where(v, tap, 0.0)
                cols_ref[k * CP:k * CP + C, :] = tap

    # ---- t = SiLU(BN1(conv3x3(x2)))  (DCnv2 stem), one K = 9*CP GEMM ------------
    im2col(x2)
    t = jnp.dot(_mx(w1_ref[...]), _mx(cols_ref[...]),
                preferred_element_type=jnp.float32)
    t = _silu(t * s1 + b1)

    # ---- offset + mask convs merged into ONE GEMM over the same im2col(t) -------
    im2col(t)
    om_ref[...] = jnp.dot(_mx(w_om_ref[...]), _mx(cols_ref[...]),
                          preferred_element_type=jnp.float32) + b_om_ref[...]

    # ---- modulated deformable bilinear sampling as one-hot MXU matmuls ----------
    hrow = rw.astype(jnp.float32) * (1.0 / W)      # exact image-row index
    wcol_f = wcol.astype(jnp.float32)
    src = jax.lax.broadcasted_iota(jnp.int32, (HW, HW), 0)   # source pixel id
    for k in range(9):
        ki, kj = divmod(k, 3)
        dy = om_ref[2 * k:2 * k + 1, :]            # (1, HW)
        dx = om_ref[2 * k + 1:2 * k + 2, :]
        mk = _sigmoid(om_ref[18 + k:19 + k, :])    # modulation mask for tap k
        py = hrow + (ki - 1) + dy
        px = wcol_f + (kj - 1) + dx
        y0 = jnp.floor(py)
        x0 = jnp.floor(px)
        wy = py - y0
        wx = px - x0
        gmat = jnp.zeros((HW, HW), jnp.float32)    # gather matrix: [src, dst]
        for oy in (0, 1):
            for ox in (0, 1):
                yy = y0 + oy
                xx = x0 + ox
                wgt = (wy if oy else 1.0 - wy) * (wx if ox else 1.0 - wx) * mk
                ok = (yy >= 0) & (yy <= H - 1) & (xx >= 0) & (xx <= W - 1)
                wgt = jnp.where(ok, wgt, 0.0)
                idx = (jnp.clip(yy, 0, H - 1) * W
                       + jnp.clip(xx, 0, W - 1)).astype(jnp.int32)
                gmat = gmat + jnp.where(src == idx, wgt, 0.0)
        cols_ref[k * CP:k * CP + C, :] = jnp.dot(
            _mx(t), _mx(gmat), preferred_element_type=jnp.float32)

    # ---- a = ReLU(BN3(SiLU(BN2(DeformConv(t) + b_def)))), one K = 9*CP GEMM -----
    d = jnp.dot(_mx(w_def_ref[...]), _mx(cols_ref[...]),
                preferred_element_type=jnp.float32)
    a = jnp.maximum(_silu(d * s2 + b2) * s3 + b3, 0.0)

    # ---- channel attention: softmax(avg ⊗ max) @ x1 -----------------------------
    avg_c = jnp.mean(a, axis=-1, keepdims=True)            # (C, 1)
    mx_r = jnp.max(a[None], axis=-1)                        # (1, C)
    l1 = avg_c * mx_r
    e1 = jnp.exp(l1 - jnp.max(l1, axis=-1, keepdims=True))
    attn1 = e1 * pl.reciprocal(jnp.sum(e1, axis=-1, keepdims=True), approx=True)
    out1 = jnp.dot(_mx(attn1), _mx(x1), preferred_element_type=jnp.float32)

    # ---- b branch: ReLU(BN(conv1x1(x1))); spatial attention2, all lane-dense ----
    bmap = jnp.maximum(
        jnp.dot(_mx(w_1x1_ref[...]), _mx(x1), preferred_element_type=jnp.float32)
        * s4 + b4, 0.0)
    q_i = src                                               # reuse (HW, HW) iota
    p_i = jax.lax.broadcasted_iota(jnp.int32, (HW, HW), 1)
    same_row = jnp.where((q_i - q_i % W) == (p_i - p_i % W), 1.0, 0.0)
    same_col = jnp.where((q_i % W) == (p_i % W), 1.0, 0.0)
    s_h = jnp.dot(_mx(bmap), _mx(same_row),
                  preferred_element_type=jnp.float32) * (1.0 / W)
    s_w = jnp.dot(_mx(bmap), _mx(same_col),
                  preferred_element_type=jnp.float32) * (1.0 / H)
    l2 = s_h * s_w
    e2 = jnp.exp(l2 - jnp.max(l2, axis=-1, keepdims=True))  # per-row stabilization
    den2 = jnp.dot(_mx(e2), _mx(same_row), preferred_element_type=jnp.float32)
    attn2 = e2 * pl.reciprocal(den2, approx=True)

    fused = x1 + x2 + g_ref[0] * out1 + x2 * attn2
    o_ref[...] = fused[None].astype(o_ref.dtype)


# ------------------------------- wrapper ----------------------------------------

def _fold_bn(bn, eps=1e-5):
    g, b, mu, var = bn
    s = g / jnp.sqrt(var + eps)
    return s, b - mu * s


def _pack_conv_w(w, cp):
    # (O, I, 3, 3) -> (O, 9*cp); column index = tap*cp + in_channel (zero-padded)
    I = w.shape[1]
    wt = jnp.transpose(w, (0, 2, 3, 1))
    wt = jnp.pad(wt, ((0, 0), (0, 0), (0, 0), (0, cp - I)))
    return wt.reshape(w.shape[0], 9 * cp)


def amf_forward_pallas(P, x1, x2):
    m, C, H, W = x1.shape              # module math requires out_channels == C
    HW = H * W
    CP = _ru(C, 8)

    s1, b1 = _fold_bn(P["bn1_d"])
    s2, b2 = _fold_bn(P["bn2_d"])
    s3, b3 = _fold_bn(P["bn3"])
    s4, b4 = _fold_bn(P["bn_c1"])
    aff = jnp.stack([s1, b1,
                     s2, s2 * P["b_def"] + b2,
                     s3, b3,
                     s4, s4 * P["b_1x1"] + b4], axis=1).astype(jnp.float32)

    w1 = _pack_conv_w(P["w_dc1"], CP)
    w_om = _pack_conv_w(jnp.concatenate([P["w_off"], P["w_msk"]], axis=0), CP)
    b_om = jnp.concatenate([P["b_off"], P["b_msk"]]).reshape(27, 1).astype(jnp.float32)
    w_def = _pack_conv_w(P["w_def"], CP)
    w_1x1 = P["w_1x1"].reshape(C, C)
    gamma = jnp.asarray(P["gamma"], jnp.float32).reshape(1)

    kernel = functools.partial(_amf_kernel, H=H, W=W)
    out = pl.pallas_call(
        kernel,
        out_shape=jax.ShapeDtypeStruct((m, C, HW), jnp.float32),
        grid=(m,),
        in_specs=[
            pl.BlockSpec((1, C, HW), lambda i: (i, 0, 0)),       # x1
            pl.BlockSpec((1, C, HW), lambda i: (i, 0, 0)),       # x2
            pl.BlockSpec((C, 9 * CP), lambda i: (0, 0)),         # conv1 weights
            pl.BlockSpec((27, 9 * CP), lambda i: (0, 0)),        # offset|mask weights
            pl.BlockSpec((27, 1), lambda i: (0, 0)),             # offset|mask bias
            pl.BlockSpec((C, 9 * CP), lambda i: (0, 0)),         # deform-conv weights
            pl.BlockSpec((C, C), lambda i: (0, 0)),              # 1x1 conv weights
            pl.BlockSpec((C, 8), lambda i: (0, 0)),              # packed affine table
            pl.BlockSpec(memory_space=pltpu.MemorySpace.SMEM),   # gamma
        ],
        out_specs=pl.BlockSpec((1, C, HW), lambda i: (i, 0, 0)),
        scratch_shapes=[pltpu.VMEM((9 * CP, HW), jnp.float32),   # tap-stacked operand
                        pltpu.VMEM((27, HW), jnp.float32)],      # offset / mask rows
        compiler_params=pltpu.CompilerParams(dimension_semantics=("parallel",)),
    )(x1.reshape(m, C, HW).astype(jnp.float32),
      x2.reshape(m, C, HW).astype(jnp.float32),
      _mx(w1), _mx(w_om), b_om, _mx(w_def), _mx(w_1x1), aff, gamma)
    return out.reshape(m, C, H, W)


# --------------------------- pure-JAX reference ----------------------------------

def deform_sample(x, offset, mask):
    # torchvision-style modulated bilinear sampling (reference path only).
    N, C, H, W = x.shape
    K = 3
    off = offset.reshape(N, K * K, 2, H, W)
    dy, dx = off[:, :, 0], off[:, :, 1]
    kk = jnp.arange(K * K)
    ky = (kk // K).astype(jnp.float32)[None, :, None, None]
    kx = (kk % K).astype(jnp.float32)[None, :, None, None]
    base_y = jnp.arange(H, dtype=jnp.float32)[None, None, :, None]
    base_x = jnp.arange(W, dtype=jnp.float32)[None, None, None, :]
    py = base_y - 1.0 + ky + dy
    px = base_x - 1.0 + kx + dx

    y0 = jnp.floor(py)
    x0 = jnp.floor(px)
    wy1 = py - y0
    wx1 = px - x0
    xf = x.reshape(N, C, H * W)

    def gather(yy, xx):
        valid = (yy >= 0) & (yy <= H - 1) & (xx >= 0) & (xx <= W - 1)
        yyc = jnp.clip(yy, 0, H - 1).astype(jnp.int32)
        xxc = jnp.clip(xx, 0, W - 1).astype(jnp.int32)
        idx = (yyc * W + xxc).reshape(N, 1, K * K * H * W)
        idx = jnp.broadcast_to(idx, (N, C, K * K * H * W))
        g = jnp.take_along_axis(xf, idx, axis=2).reshape(N, C, K * K, H, W)
        return g * valid.astype(x.dtype)[:, None]

    val = jnp.zeros((N, C, K * K, H, W), x.dtype)
    for oy, ox, wgt in ((0, 0, (1 - wy1) * (1 - wx1)),
                        (0, 1, (1 - wy1) * wx1),
                        (1, 0, wy1 * (1 - wx1)),
                        (1, 1, wy1 * wx1)):
        val = val + wgt[:, None] * gather(y0 + oy, x0 + ox)
    val = val * mask[:, None]
    return val.reshape(N, C * K * K, H, W)


def amf_forward_ref(P, x1, x2):
    m, C, H, W = x1.shape

    def conv3x3(x, w, bias=None):
        y = jax.lax.conv_general_dilated(
            x, w, (1, 1), ((1, 1), (1, 1)),
            dimension_numbers=("NCHW", "OIHW", "NCHW"))
        return y if bias is None else y + bias[None, :, None, None]

    def bn(x, p):
        s, t = _fold_bn(p)
        return x * s[None, :, None, None] + t[None, :, None, None]

    silu = lambda v: v * jax.nn.sigmoid(v)

    t = silu(bn(conv3x3(x2, P["w_dc1"]), P["bn1_d"]))
    offset = conv3x3(t, P["w_off"], P["b_off"])
    mask = jax.nn.sigmoid(conv3x3(t, P["w_msk"], P["b_msk"]))
    sampled = deform_sample(t, offset, mask)
    d = jnp.einsum("nkhw,ok->nohw", sampled, P["w_def"].reshape(C, C * 9))
    d = d + P["b_def"][None, :, None, None]
    a = jax.nn.relu(bn(silu(bn(d, P["bn2_d"])), P["bn3"]))

    avg = jnp.mean(a, axis=(2, 3))
    mx = jnp.max(a, axis=(2, 3))
    attn1 = jax.nn.softmax(avg[:, :, None] * mx[:, None, :], axis=-1)
    out1 = jnp.einsum("bij,bjk->bik", attn1, x1.reshape(m, C, H * W))
    out1 = out1.reshape(m, C, H, W)

    b1x1 = jnp.einsum("nchw,oc->nohw", x1, P["w_1x1"].reshape(C, C))
    b1x1 = b1x1 + P["b_1x1"][None, :, None, None]
    bmap = jax.nn.relu(bn(b1x1, P["bn_c1"]))
    s_h = jnp.mean(bmap, axis=3, keepdims=True)
    s_w = jnp.mean(bmap, axis=2, keepdims=True)
    attn2 = jax.nn.softmax(s_h * s_w, axis=-1)
    return x1 + x2 + P["gamma"] * out1 + x2 * attn2


# ------------------------------ parameters ---------------------------------------

def init_params(key, c_in, c_out):
    ks = jax.random.split(key, 12)
    nrm = lambda k, shp, s=0.1: s * jax.random.normal(k, shp, jnp.float32)

    def bn_params(k, c):
        k1, k2, k3, k4 = jax.random.split(k, 4)
        return (1.0 + 0.1 * jax.random.normal(k1, (c,), jnp.float32),   # gamma
                0.05 * jax.random.normal(k2, (c,), jnp.float32),        # beta
                0.05 * jax.random.normal(k3, (c,), jnp.float32),        # running mean
                jax.random.uniform(k4, (c,), jnp.float32, 0.5, 1.5))    # running var

    return {
        "w_dc1": nrm(ks[0], (c_out, c_in, 3, 3)),          # DCnv2.conv1 (bias=False)
        "bn1_d": bn_params(ks[1], c_out),
        "w_off": nrm(ks[2], (18, c_out, 3, 3)),            # conv2_offset
        "b_off": nrm(ks[3], (18,), 0.05),
        "w_msk": nrm(ks[4], (9, c_out, 3, 3)),             # conv2_mask
        "b_msk": nrm(ks[5], (9,), 0.05),
        "w_def": nrm(ks[6], (c_out, c_out, 3, 3)),         # DeformConv2d weight
        "b_def": nrm(ks[7], (c_out,), 0.05),
        "bn2_d": bn_params(ks[8], c_out),
        "bn3": bn_params(ks[9], c_out),                    # Sequential outer BN
        "w_1x1": nrm(ks[10], (c_out, c_in, 1, 1)),         # conv1 branch (1x1)
        "b_1x1": nrm(ks[11], (c_out,), 0.05),
        "bn_c1": bn_params(jax.random.fold_in(key, 100), c_out),
        # nn.Parameter(torch.zeros(1)); nonzero so the attention1 path contributes.
        "gamma": jnp.float32(0.5),
    }


if __name__ == "__main__":
    _probe_roll_semantics()

    key = jax.random.PRNGKey(0)
    kp, kx1, kx2 = jax.random.split(key, 3)
    B, C, H, W = 2, 4, 16, 16          # in_channels == out_channels == 4
    params = init_params(kp, C, C)
    x1 = jax.random.normal(kx1, (B, C, H, W), jnp.float32)
    x2 = jax.random.normal(kx2, (B, C, H, W), jnp.float32)

    fwd = jax.jit(amf_forward_pallas)
    out = jax.block_until_ready(fwd(params, x1, x2))
    ref = jax.block_until_ready(amf_forward_ref(params, x1, x2))

    err = float(jnp.max(jnp.abs(out - ref)))
    assert out.shape == (B, C, H, W)
    assert np.isfinite(np.asarray(out)).all()
    assert err < 2e-2, f"max abs error {err}"
    print("KERNEL_OK")
</pallas_src>

<mosaic_0001>
module attributes {stable_mosaic.version = 11 : i64} {
  func.func @k(%arg0: memref<8x128xf32, #tpu.memory_space<vmem>>, %arg1: memref<8x128xf32, #tpu.memory_space<vmem>>) attributes {dimension_semantics = [], scalar_prefetch = 0 : i64, scratch_operands = 0 : i64, tpu.core_type = #tpu.core_type<tc>} {
    %c0 = arith.constant 0 : index
    %c0_0 = arith.constant 0 : index
    %0 = vector.load %arg0[%c0, %c0_0] : memref<8x128xf32, #tpu.memory_space<vmem>>, vector<8x128xf32>
    %c1_i32 = arith.constant 1 : i32
    %1 = tpu.dynamic_rotate %0 by %c1_i32 dim 1 : vector<8x128xf32>, i32 -> vector<8x128xf32>
    %c0_1 = arith.constant 0 : index
    %c0_2 = arith.constant 0 : index
    %2 = vector.load %arg1[%c0_1, %c0_2] : memref<8x128xf32, #tpu.memory_space<vmem>>, vector<8x128xf32>
    tpu.vector_store %arg1[%c0_1, %c0_2], %1 {strides = array<i32>} : memref<8x128xf32, #tpu.memory_space<vmem>>, vector<8x128xf32>,
    return
  }
}

</mosaic_0001>

<bundles_post_ra>
// kernel: tpu_custom_call.1
= control target key start
LH: loop header
LB: loop body
LE: loop exit
PB: predicated region body
PF: predicated region fallthrough
CT: control target
= control target key end

     0   :  { %6 = vsyncpa [#allocation3], 0  ;;  %s106_s0 = inlined_call_operand.hbm [shape: f32[8,128], index: 0, kind: input, shape index: {}]   ;;  %s107_s1 = inlined_call_operand.hbm [shape: f32[8,128], index: 1, kind: output, shape index: {}]  }
   0x1   :  { %7 = vsyncpa [#allocation4], 0  ;;  %s87_s6 = smov [#allocation2]  }
   0x2   :  { %s14_s7 = sshll.u32 %s87_s6, 4  ;;  %s15_s7 = int_to_ptr.vmem [resolvable:$true] %s14_s7 }
   0x3   :  { %s51_s8 = scalar_lea.vmem %s15_s7, 128  ;;  %p56_p1 = scmp.lt.s32.totalorder %s15_s7, %s15_s7 }
   0x4   :  { %p52_p0 = scmp.ne.s32.totalorder %s15_s7, %s51_s8  ;;  %p57_p2 = scmp.lt.s32.totalorder %s51_s8, %s51_s8 }
   0x6   :  { %p58_p3 = por %p57_p2, %p56_p1 }
   0x8   :  { %p59_p4 = pnand %p58_p3, %p52_p0 }
   0xa   :  { %62 = shalt.err (!%p59_p4)
}
   0xb   :  { %17 = dma.hbm_to_vmem [thread:$0]  %s106_s0, 128, %s15_s7, [#allocation3]  }
   0xc   :  { %83 = dma.done.wait [#allocation3], 128  }
   0xd   :  { %84 = vsyncadd [#allocation3], 4294967168  ;;  %v21_v0 = vld [vmem:[#allocation2] sm:$0xff]  ;;  %s88_s11 = smov 1   ;;  %s89_s12 = smov [#allocation5]  }
   0xe   :  { %22 = vrot.lane.b32.xlu0 %v21_v0, %s88_s11  ;;  %s31_s13 = sshll.u32 %s89_s12, 4  ;;  %s32_s13 = int_to_ptr.vmem [resolvable:$true] %s31_s13 }
   0xf   :  { %s63_s14 = scalar_lea.vmem %s32_s13, 128  ;;  %p68_p6 = scmp.lt.s32.totalorder %s32_s13, %s32_s13 }
  0x10   :  { %p64_p5 = scmp.ne.s32.totalorder %s32_s13, %s63_s14  ;;  %p69_p7 = scmp.lt.s32.totalorder %s63_s14, %s63_s14 }
  0x12   :  { %p70_p8 = por %p69_p7, %p68_p6 }
  0x14   :  { %p71_p9 = pnand %p70_p8, %p64_p5 }
  0x80   :  { %v23_v1 = vpop.permute.xlu0 %22 }
  0x81   :  { %24 = vst [vmem:[#allocation5] sm:$0xff] %v23_v1 }
  0x82   :  { %74 = shalt.err (!%p71_p9)
}
  0x83   :  { %34 = dma.vmem_to_hbm [thread:$0]  %s32_s13, 128, %s107_s1, [#allocation4]  }
  0x84   :  { %85 = dma.done.wait [#allocation4], 128  }
  0x85   :  { %86 = vsyncadd [#allocation4], 4294967168 }
  0x86   :  { %38 = vsyncpa [#allocation3], 1 }
  0x87   :  { %39 = vsyncpa [#allocation4], 1 }

</bundles_post_ra>
